<compile_context>
chip_gen: v7x
topology: tpu7x:2x2x1
jax: 0.10.0
libtpu: 0.0.40
codegen_flags: <defaults>
</compile_context>

<pallas_src>
import functools

import jax
import jax.numpy as jnp
from jax.experimental import pallas as pl
from jax.experimental.pallas import tpu as pltpu


def _round_up(x, m):
    return (x + m - 1) // m * m


def _vqvae_kernel(inv_act_scale, n_groups, n_global, tile_n,
                  # inputs
                  state_ref,
                  w1_ref, b1_ref, w2_ref, b2_ref, wf_ref, bf_ref,
                  cb_ref, cb_bf_ref, cb_sq_ref,
                  v1_ref, c1_ref, v2_ref, c2_ref, vf_ref, cf_ref,
                  # outputs
                  dec_ref, code_ref, pres_ref, enc_ref, vq_ref):
    tile_i = pl.program_id(0)
    row = tile_i * tile_n + jax.lax.broadcasted_iota(jnp.int32, (tile_n, 1), 0)
    row_valid = row < n_global                                    # (tile_n, 1) bool
    row_mask = row_valid.astype(jnp.float32)

    x = state_ref[...] * inv_act_scale                            # (tile_n, A) f32

    def dense(inp, w_ref, b_ref, relu):
        # bf16 MXU matmul (weights pre-cast in wrapper), f32 accumulation.
        y = jnp.dot(inp.astype(jnp.bfloat16), w_ref[...],
                    preferred_element_type=jnp.float32) + b_ref[...]
        return jnp.maximum(y, 0.0) if relu else y

    # ---- EncoderMLP: Linear -> ReLU -> Linear -> ReLU -> Linear(fc) ----
    h = dense(x, w1_ref, b1_ref, True)
    h = dense(h, w2_ref, b2_ref, True)
    z = dense(h, wf_ref, bf_ref, False)                           # (tile_n, D)

    e_pad = pres_ref.shape[-1]
    # lane iota hoisted out of the per-group loop (no CSE of broadcast_in_dim)
    lane = jax.lax.broadcasted_iota(jnp.int32, (tile_n, e_pad), 1)

    # ---- Residual VQ (nearest-neighbour quantization + commitment MSE loss) ----
    # TODO(synk): the library ResidualVQ also carries EMA codebook updates /
    # kmeans init / optional projections; only the inference quantization path
    # and the commitment loss are reproduced here.
    residual = z
    quant = jnp.zeros_like(z)
    vq_sum = jnp.zeros((1, 1), jnp.float32)
    pres = jnp.zeros((1, e_pad), jnp.float32)
    code_cols = []
    for g in range(n_groups):
        # cross term in bf16 (f32 accumulate); padded codebook rows are zero.
        cross = jax.lax.dot_general(
            residual.astype(jnp.bfloat16), cb_bf_ref[g],
            (((1,), (1,)), ((), ())),
            preferred_element_type=jnp.float32)                   # (tile_n, e_pad)
        # argmin of (||r||^2 - 2 r.c + ||c||^2) == argmin of (||c||^2 - 2 r.c);
        # padded lanes carry ||c||^2 = 1e30 so they never win.
        score = cb_sq_ref[g] - 2.0 * cross                        # (tile_n, e_pad)

        min_s = jnp.min(score, axis=-1, keepdims=True)            # (tile_n, 1)
        idx = jnp.min(jnp.where(score <= min_s, lane, e_pad),
                      axis=-1, keepdims=True)                     # (tile_n, 1)

        onehot = (lane == idx).astype(jnp.float32)                # (tile_n, e_pad)
        # exact f32 lookup of the selected code vectors
        q_g = jnp.dot(onehot, cb_ref[g], preferred_element_type=jnp.float32)

        # commitment loss partial sum of this quantizer (padded rows masked out)
        diff = q_g - residual
        vq_sum = vq_sum + jnp.sum(
            jnp.sum(diff * diff, axis=-1, keepdims=True) * row_mask,
            axis=0, keepdims=True)

        # code-usage presence for perplexity (padded rows masked out)
        pres = jnp.maximum(pres, jnp.max(onehot * row_mask, axis=0, keepdims=True))

        code_cols.append(idx)
        quant = quant + q_g
        residual = residual - q_g

    # single lane-concatenated code store per tile
    code_ref[...] = jnp.concatenate(code_cols, axis=1)

    # ---- Decoder MLP on the summed quantized latent ----
    hd = dense(quant, v1_ref, c1_ref, True)
    hd = dense(hd, v2_ref, c2_ref, True)
    dec = dense(hd, vf_ref, cf_ref, False)                        # (tile_n, A)
    dec_ref[...] = dec

    # ---- per-tile loss partial sums (normalized by global N in the wrapper) ----
    abs_err = jnp.abs(x - dec) * row_mask
    enc_sum = jnp.sum(jnp.sum(abs_err, axis=-1, keepdims=True),
                      axis=0, keepdims=True)                      # (1, 1)

    zeros_lane = jnp.zeros((1, 128), jnp.float32)
    enc_ref[0] = enc_sum + zeros_lane                             # lane-dense store
    vq_ref[0] = vq_sum + zeros_lane
    pres_ref[0] = pres


def _resident_spec(arr):
    nd = arr.ndim
    return pl.BlockSpec(arr.shape, lambda i, nd=nd: (0,) * nd)


def vqvae_forward(state, params, *, act_scale=1.0, encoder_loss_multiplier=1.0):
    """Mirrors VqVae.forward.  state: (N, T, A) with T == 1 (input_dim_h == 1)."""
    if state.shape[-2] != 1:
        raise ValueError("kernel assumes input_dim_h == 1 (T axis of size 1)")
    x = jnp.squeeze(state, axis=-2).astype(jnp.float32)            # (N, A)
    n, a = x.shape
    g, e, d_lat = params["codebook"].shape
    hidden = params["w1"].shape[1]

    tile_n = min(512, _round_up(n, 8))
    n_pad = _round_up(n, tile_n)
    num_tiles = n_pad // tile_n
    e_pad = _round_up(e, 128)

    if n_pad != n:
        x_pad = jnp.zeros((n_pad, a), jnp.float32).at[:n].set(x)
    else:
        x_pad = x

    # Lane-padded codebook: padded rows are zero (contribute nothing to q_g) and
    # carry a huge squared norm so they never win the argmin.
    cb = params["codebook"].astype(jnp.float32)                    # (G, E, D)
    cb_pad = jnp.zeros((g, e_pad, d_lat), jnp.float32).at[:, :e, :].set(cb)
    cb_bf = cb_pad.astype(jnp.bfloat16)
    cb_sq = jnp.sum(cb_pad * cb_pad, axis=-1)[:, None, :]           # (G, 1, e_pad)
    cb_sq = cb_sq.at[:, :, e:].set(1e30)

    bf16 = jnp.bfloat16
    param_list = [
        params["w1"].astype(bf16), params["b1"],
        params["w2"].astype(bf16), params["b2"],
        params["wf"].astype(bf16), params["bf"],
        cb_pad, cb_bf, cb_sq,
        params["v1"].astype(bf16), params["c1"],
        params["v2"].astype(bf16), params["c2"],
        params["vf"].astype(bf16), params["cf"],
    ]

    kernel = functools.partial(
        _vqvae_kernel, 1.0 / float(act_scale), int(g), int(n), int(tile_n))

    in_specs = ([pl.BlockSpec((tile_n, a), lambda i: (i, 0))]
                + [_resident_spec(p) for p in param_list])
    out_specs = (
        pl.BlockSpec((tile_n, a), lambda i: (i, 0)),               # dec_out
        pl.BlockSpec((tile_n, g), lambda i: (i, 0)),               # vq_code
        pl.BlockSpec((1, 1, e_pad), lambda i: (i, 0, 0)),          # code presence
        pl.BlockSpec((1, 1, 128), lambda i: (i, 0, 0)),            # enc loss partial
        pl.BlockSpec((1, 1, 128), lambda i: (i, 0, 0)),            # vq loss partial
    )
    out_shapes = (
        jax.ShapeDtypeStruct((n_pad, a), jnp.float32),
        jax.ShapeDtypeStruct((n_pad, g), jnp.int32),
        jax.ShapeDtypeStruct((num_tiles, 1, e_pad), jnp.float32),
        jax.ShapeDtypeStruct((num_tiles, 1, 128), jnp.float32),
        jax.ShapeDtypeStruct((num_tiles, 1, 128), jnp.float32),
    )

    flops = 2 * n * (a * hidden + hidden * hidden + hidden * d_lat   # encoder
                     + 2 * g * e_pad * d_lat                         # VQ cross + select
                     + d_lat * hidden + hidden * hidden + hidden * a)  # decoder
    bytes_accessed = (x_pad.size * 4
                      + sum(int(p.size) * p.dtype.itemsize for p in param_list)
                      + n_pad * a * 4 + n_pad * g * 4
                      + num_tiles * (e_pad + 256) * 4)
    cost = pl.CostEstimate(flops=int(flops), transcendentals=0,
                           bytes_accessed=int(bytes_accessed))

    dec_out, vq_code, pres, enc_part, vq_part = pl.pallas_call(
        kernel,
        grid=(num_tiles,),
        in_specs=in_specs,
        out_specs=out_specs,
        out_shape=out_shapes,
        compiler_params=pltpu.CompilerParams(
            dimension_semantics=("parallel",),
            vmem_limit_bytes=32 * 1024 * 1024),
        cost_estimate=cost,
    )(x_pad, *param_list)

    dec_out = dec_out[:n]
    vq_code = vq_code[:n]

    # global normalization in the wrapper (tile-size independent)
    enc_loss = jnp.sum(enc_part[:, 0, 0]) / float(n * a)            # L1 recon loss
    vq_loss = jnp.sum(vq_part[:, 0, 0]) / float(n * d_lat)          # summed per-group MSE
    rep_loss = enc_loss * encoder_loss_multiplier + vq_loss * 5.0
    # pp = len(unique(vq_code)) / 1024 (hard-coded 1024 matches the reference)
    pp = jnp.sum(jnp.max(pres[:, 0, :], axis=0)) / 1024.0
    return dec_out, rep_loss, enc_loss, vq_loss, pp


# ------------- deterministic parameter construction (plain JAX glue) -------------

def _orthogonal(key, shape):
    """Deterministic orthogonal init (matches torch orthogonal_ semantics, gain=1)."""
    rows, cols = shape
    big, small = max(rows, cols), min(rows, cols)
    m = jax.random.normal(key, (big, small), jnp.float32)
    q, r = jnp.linalg.qr(m)
    q = q * jnp.sign(jnp.diagonal(r))
    if rows < cols:
        q = q.T
    return q[:rows, :cols].astype(jnp.float32)


def make_params(key, input_dim_w, hidden_dim, n_latent_dims, n_embed, groups):
    ks = jax.random.split(key, 8)
    # Encoder: Linear(A,H) ReLU Linear(H,H) ReLU fc Linear(H,D); zero biases.
    # Decoder: Linear(D,H) ReLU Linear(H,H) ReLU fc Linear(H,A); zero biases.
    return {
        "w1": _orthogonal(ks[0], (input_dim_w, hidden_dim)),
        "b1": jnp.zeros((1, hidden_dim), jnp.float32),
        "w2": _orthogonal(ks[1], (hidden_dim, hidden_dim)),
        "b2": jnp.zeros((1, hidden_dim), jnp.float32),
        "wf": _orthogonal(ks[2], (hidden_dim, n_latent_dims)),
        "bf": jnp.zeros((1, n_latent_dims), jnp.float32),
        "v1": _orthogonal(ks[3], (n_latent_dims, hidden_dim)),
        "c1": jnp.zeros((1, hidden_dim), jnp.float32),
        "v2": _orthogonal(ks[4], (hidden_dim, hidden_dim)),
        "c2": jnp.zeros((1, hidden_dim), jnp.float32),
        "vf": _orthogonal(ks[5], (hidden_dim, input_dim_w)),
        "cf": jnp.zeros((1, input_dim_w), jnp.float32),
        # Residual-VQ codebooks: (groups, n_embed, dim), deterministic normal init.
        "codebook": 0.1 * jax.random.normal(
            ks[6], (groups, n_embed, n_latent_dims), jnp.float32),
    }


if __name__ == "__main__":
    # Small but consistent shapes: batch=8, T=input_dim_h=1, A=input_dim_w=7,
    # hidden=32, latent=64, codebook_size=16, groups=2.
    N, T, A = 8, 1, 7
    H, D, E, G = 32, 64, 16, 2

    key = jax.random.PRNGKey(0)
    k_param, k_state = jax.random.split(key)
    params = make_params(k_param, input_dim_w=A, hidden_dim=H,
                         n_latent_dims=D, n_embed=E, groups=G)
    state = jax.random.normal(k_state, (N, T, A), jnp.float32)

    outs = vqvae_forward(state, params, act_scale=1.0, encoder_loss_multiplier=1.0)
    outs = jax.block_until_ready(outs)

    dec_out, rep_loss, encoder_loss, vq_loss_state, pp = outs
    assert dec_out.shape == (N, A)
    assert rep_loss.shape == () and encoder_loss.shape == () and vq_loss_state.shape == ()
    assert pp.shape == ()
    print("KERNEL_OK")
</pallas_src>

<mosaic_0001>
module attributes {stable_mosaic.version = 11 : i64} {
  func.func @_vqvae_kernel(%arg0: i32, %arg1: memref<8x7xf32, #tpu.memory_space<vmem>>, %arg2: memref<7x32xbf16, #tpu.memory_space<vmem>>, %arg3: memref<1x32xf32, #tpu.memory_space<vmem>>, %arg4: memref<32x32xbf16, #tpu.memory_space<vmem>>, %arg5: memref<1x32xf32, #tpu.memory_space<vmem>>, %arg6: memref<32x64xbf16, #tpu.memory_space<vmem>>, %arg7: memref<1x64xf32, #tpu.memory_space<vmem>>, %arg8: memref<2x128x64xf32, #tpu.memory_space<vmem>>, %arg9: memref<2x128x64xbf16, #tpu.memory_space<vmem>>, %arg10: memref<2x1x128xf32, #tpu.memory_space<vmem>>, %arg11: memref<64x32xbf16, #tpu.memory_space<vmem>>, %arg12: memref<1x32xf32, #tpu.memory_space<vmem>>, %arg13: memref<32x32xbf16, #tpu.memory_space<vmem>>, %arg14: memref<1x32xf32, #tpu.memory_space<vmem>>, %arg15: memref<32x7xbf16, #tpu.memory_space<vmem>>, %arg16: memref<1x7xf32, #tpu.memory_space<vmem>>, %arg17: memref<8x7xf32, #tpu.memory_space<vmem>>, %arg18: memref<8x2xi32, #tpu.memory_space<vmem>>, %arg19: memref<1x1x128xf32, #tpu.memory_space<vmem>>, %arg20: memref<1x1x128xf32, #tpu.memory_space<vmem>>, %arg21: memref<1x1x128xf32, #tpu.memory_space<vmem>>) attributes {dimension_semantics = [#tpu.dimension_semantics<parallel>], iteration_bounds = array<i64: 1>, scalar_prefetch = 0 : i64, scratch_operands = 0 : i64, tpu.core_type = #tpu.core_type<tc>, window_params = [{transform_indices = @transform_0, window_bounds = array<i64: 8, 7>}, {pipeline_mode = #tpu.pipeline_mode<synchronous>, transform_indices = @transform_1, window_bounds = array<i64: 7, 32>}, {pipeline_mode = #tpu.pipeline_mode<synchronous>, transform_indices = @transform_2, window_bounds = array<i64: 1, 32>}, {pipeline_mode = #tpu.pipeline_mode<synchronous>, transform_indices = @transform_3, window_bounds = array<i64: 32, 32>}, {pipeline_mode = #tpu.pipeline_mode<synchronous>, transform_indices = @transform_4, window_bounds = array<i64: 1, 32>}, {pipeline_mode = #tpu.pipeline_mode<synchronous>, transform_indices = @transform_5, window_bounds = array<i64: 32, 64>}, {pipeline_mode = #tpu.pipeline_mode<synchronous>, transform_indices = @transform_6, window_bounds = array<i64: 1, 64>}, {pipeline_mode = #tpu.pipeline_mode<synchronous>, transform_indices = @transform_7, window_bounds = array<i64: 2, 128, 64>}, {pipeline_mode = #tpu.pipeline_mode<synchronous>, transform_indices = @transform_8, window_bounds = array<i64: 2, 128, 64>}, {pipeline_mode = #tpu.pipeline_mode<synchronous>, transform_indices = @transform_9, window_bounds = array<i64: 2, 1, 128>}, {pipeline_mode = #tpu.pipeline_mode<synchronous>, transform_indices = @transform_10, window_bounds = array<i64: 64, 32>}, {pipeline_mode = #tpu.pipeline_mode<synchronous>, transform_indices = @transform_11, window_bounds = array<i64: 1, 32>}, {pipeline_mode = #tpu.pipeline_mode<synchronous>, transform_indices = @transform_12, window_bounds = array<i64: 32, 32>}, {pipeline_mode = #tpu.pipeline_mode<synchronous>, transform_indices = @transform_13, window_bounds = array<i64: 1, 32>}, {pipeline_mode = #tpu.pipeline_mode<synchronous>, transform_indices = @transform_14, window_bounds = array<i64: 32, 7>}, {pipeline_mode = #tpu.pipeline_mode<synchronous>, transform_indices = @transform_15, window_bounds = array<i64: 1, 7>}, {transform_indices = @transform_16, window_bounds = array<i64: 8, 7>}, {transform_indices = @transform_17, window_bounds = array<i64: 8, 2>}, {transform_indices = @transform_18, window_bounds = array<i64: 1, 1, 128>}, {transform_indices = @transform_19, window_bounds = array<i64: 1, 1, 128>}, {transform_indices = @transform_20, window_bounds = array<i64: 1, 1, 128>}]} {
    %c8_i32 = arith.constant 8 : i32
    %0 = arith.muli %arg0, %c8_i32 : i32
    %1 = tpu.iota {dimensions = array<i32: 0>} : vector<8x1xi32>
    %2 = vector.broadcast %0 : i32 to vector<8x1xi32>
    %3 = arith.addi %2, %1 : vector<8x1xi32>
    %c8_i32_0 = arith.constant 8 : i32
    %4 = vector.broadcast %c8_i32_0 : i32 to vector<8x1xi32>
    %5 = arith.cmpi slt, %3, %4 : vector<8x1xi32>
    %6 = arith.extui %5 : vector<8x1xi1> to vector<8x1xi32>
    %7 = arith.sitofp %6 : vector<8x1xi32> to vector<8x1xf32>
    %c0 = arith.constant 0 : index
    %c0_1 = arith.constant 0 : index
    %8 = vector.load %arg1[%c0, %c0_1] : memref<8x7xf32, #tpu.memory_space<vmem>>, vector<8x7xf32>
    %cst = arith.constant 1.000000e+00 : f32
    %9 = vector.broadcast %cst : f32 to vector<8x7xf32>
    %10 = arith.mulf %8, %9 : vector<8x7xf32>
    %11 = arith.truncf %10 : vector<8x7xf32> to vector<8x7xbf16>
    %c0_2 = arith.constant 0 : index
    %c0_3 = arith.constant 0 : index
    %12 = vector.load %arg2[%c0_2, %c0_3] : memref<7x32xbf16, #tpu.memory_space<vmem>>, vector<7x32xbf16>
    %cst_4 = arith.constant dense<0.000000e+00> : vector<8x32xf32>
    %13 = tpu.matmul %11, %12, %cst_4 {dimension_numbers = #tpu.dot_dimension_numbers<[1], [0], [0], [1], [0, 0, 1, 1], [], []>} : vector<8x7xbf16>, vector<7x32xbf16>, vector<8x32xf32> -> vector<8x32xf32>
    %c0_5 = arith.constant 0 : index
    %c0_6 = arith.constant 0 : index
    %14 = vector.load %arg3[%c0_5, %c0_6] : memref<1x32xf32, #tpu.memory_space<vmem>>, vector<1x32xf32>
    %15 = vector.broadcast %14 : vector<1x32xf32> to vector<8x32xf32>
    %16 = arith.addf %13, %15 : vector<8x32xf32>
    %cst_7 = arith.constant 0.000000e+00 : f32
    %17 = vector.broadcast %cst_7 : f32 to vector<8x32xf32>
    %18 = arith.maximumf %16, %17 : vector<8x32xf32>
    %19 = arith.truncf %18 : vector<8x32xf32> to vector<8x32xbf16>
    %c0_8 = arith.constant 0 : index
    %c0_9 = arith.constant 0 : index
    %20 = vector.load %arg4[%c0_8, %c0_9] : memref<32x32xbf16, #tpu.memory_space<vmem>>, vector<32x32xbf16>
    %cst_10 = arith.constant dense<0.000000e+00> : vector<8x32xf32>
    %21 = tpu.matmul %19, %20, %cst_10 {dimension_numbers = #tpu.dot_dimension_numbers<[1], [0], [0], [1], [0, 0, 1, 1], [], []>} : vector<8x32xbf16>, vector<32x32xbf16>, vector<8x32xf32> -> vector<8x32xf32>
    %c0_11 = arith.constant 0 : index
    %c0_12 = arith.constant 0 : index
    %22 = vector.load %arg5[%c0_11, %c0_12] : memref<1x32xf32, #tpu.memory_space<vmem>>, vector<1x32xf32>
    %23 = vector.broadcast %22 : vector<1x32xf32> to vector<8x32xf32>
    %24 = arith.addf %21, %23 : vector<8x32xf32>
    %cst_13 = arith.constant 0.000000e+00 : f32
    %25 = vector.broadcast %cst_13 : f32 to vector<8x32xf32>
    %26 = arith.maximumf %24, %25 : vector<8x32xf32>
    %27 = arith.truncf %26 : vector<8x32xf32> to vector<8x32xbf16>
    %c0_14 = arith.constant 0 : index
    %c0_15 = arith.constant 0 : index
    %28 = vector.load %arg6[%c0_14, %c0_15] : memref<32x64xbf16, #tpu.memory_space<vmem>>, vector<32x64xbf16>
    %cst_16 = arith.constant dense<0.000000e+00> : vector<8x64xf32>
    %29 = tpu.matmul %27, %28, %cst_16 {dimension_numbers = #tpu.dot_dimension_numbers<[1], [0], [0], [1], [0, 0, 1, 1], [], []>} : vector<8x32xbf16>, vector<32x64xbf16>, vector<8x64xf32> -> vector<8x64xf32>
    %c0_17 = arith.constant 0 : index
    %c0_18 = arith.constant 0 : index
    %30 = vector.load %arg7[%c0_17, %c0_18] : memref<1x64xf32, #tpu.memory_space<vmem>>, vector<1x64xf32>
    %31 = vector.broadcast %30 : vector<1x64xf32> to vector<8x64xf32>
    %32 = arith.addf %29, %31 : vector<8x64xf32>
    %33 = tpu.iota {dimensions = array<i32: 1>} : vector<8x128xi32>
    %cst_19 = arith.constant 0.000000e+00 : f32
    %34 = vector.broadcast %cst_19 : f32 to vector<8x64xf32>
    %cst_20 = arith.constant 0.000000e+00 : f32
    %35 = vector.broadcast %cst_20 : f32 to vector<1x1xf32>
    %cst_21 = arith.constant 0.000000e+00 : f32
    %36 = vector.broadcast %cst_21 : f32 to vector<1x128xf32>
    %37 = arith.truncf %32 : vector<8x64xf32> to vector<8x64xbf16>
    %c0_22 = arith.constant 0 : index
    %c0_23 = arith.constant 0 : index
    %c0_24 = arith.constant 0 : index
    %38 = vector.load %arg9[%c0_22, %c0_23, %c0_24] : memref<2x128x64xbf16, #tpu.memory_space<vmem>>, vector<1x128x64xbf16>
    %39 = vector.shape_cast %38 : vector<1x128x64xbf16> to vector<128x64xbf16>
    %cst_25 = arith.constant dense<0.000000e+00> : vector<8x128xf32>
    %40 = tpu.matmul %37, %39, %cst_25 {dimension_numbers = #tpu.dot_dimension_numbers<[1], [1], [0], [0], [0, 0, 1, 0], [], []>} : vector<8x64xbf16>, vector<128x64xbf16>, vector<8x128xf32> -> vector<8x128xf32>
    %c0_26 = arith.constant 0 : index
    %c0_27 = arith.constant 0 : index
    %c0_28 = arith.constant 0 : index
    %41 = vector.load %arg10[%c0_26, %c0_27, %c0_28] : memref<2x1x128xf32, #tpu.memory_space<vmem>>, vector<1x1x128xf32>
    %42 = vector.shape_cast %41 : vector<1x1x128xf32> to vector<1x128xf32>
    %cst_29 = arith.constant 2.000000e+00 : f32
    %43 = vector.broadcast %cst_29 : f32 to vector<8x128xf32>
    %44 = arith.mulf %43, %40 : vector<8x128xf32>
    %45 = vector.broadcast %42 : vector<1x128xf32> to vector<8x128xf32>
    %46 = arith.subf %45, %44 : vector<8x128xf32>
    %cst_30 = arith.constant dense<0x7F800000> : vector<8xf32>
    %47 = vector.multi_reduction <minimumf>, %46, %cst_30 [1] : vector<8x128xf32> to vector<8xf32>
    %48 = vector.shape_cast %47 : vector<8xf32> to vector<8x1xf32>
    %49 = vector.broadcast %48 : vector<8x1xf32> to vector<8x128xf32>
    %50 = arith.cmpf ole, %46, %49 : vector<8x128xf32>
    %c128_i32 = arith.constant 128 : i32
    %51 = vector.broadcast %c128_i32 : i32 to vector<8x128xi32>
    %52 = arith.select %50, %33, %51 : vector<8x128xi1>, vector<8x128xi32>
    %cst_31 = arith.constant dense<2147483647> : vector<8xi32>
    %53 = vector.multi_reduction <minsi>, %52, %cst_31 [1] : vector<8x128xi32> to vector<8xi32>
    %54 = vector.shape_cast %53 : vector<8xi32> to vector<8x1xi32>
    %55 = vector.broadcast %54 : vector<8x1xi32> to vector<8x128xi32>
    %56 = arith.cmpi eq, %33, %55 : vector<8x128xi32>
    %57 = arith.extui %56 : vector<8x128xi1> to vector<8x128xi32>
    %58 = arith.sitofp %57 : vector<8x128xi32> to vector<8x128xf32>
    %c0_32 = arith.constant 0 : index
    %c0_33 = arith.constant 0 : index
    %c0_34 = arith.constant 0 : index
    %59 = vector.load %arg8[%c0_32, %c0_33, %c0_34] : memref<2x128x64xf32, #tpu.memory_space<vmem>>, vector<1x128x64xf32>
    %60 = vector.shape_cast %59 : vector<1x128x64xf32> to vector<128x64xf32>
    %cst_35 = arith.constant dense<0.000000e+00> : vector<8x64xf32>
    %61 = tpu.matmul %58, %60, %cst_35 {dimension_numbers = #tpu.dot_dimension_numbers<[1], [0], [0], [1], [0, 0, 1, 1], [], []>} : vector<8x128xf32>, vector<128x64xf32>, vector<8x64xf32> -> vector<8x64xf32>
    %62 = arith.subf %61, %32 : vector<8x64xf32>
    %63 = arith.mulf %62, %62 : vector<8x64xf32>
    %cst_36 = arith.constant dense<0.000000e+00> : vector<8xf32>
    %64 = vector.multi_reduction <add>, %63, %cst_36 [1] : vector<8x64xf32> to vector<8xf32>
    %65 = vector.shape_cast %64 : vector<8xf32> to vector<8x1xf32>
    %66 = arith.mulf %65, %7 : vector<8x1xf32>
    %cst_37 = arith.constant dense<0.000000e+00> : vector<1xf32>
    %67 = vector.multi_reduction <add>, %66, %cst_37 [0] : vector<8x1xf32> to vector<1xf32>
    %68 = vector.shape_cast %67 : vector<1xf32> to vector<1x1xf32>
    %69 = arith.addf %35, %68 : vector<1x1xf32>
    %70 = vector.broadcast %7 : vector<8x1xf32> to vector<8x128xf32>
    %71 = arith.mulf %58, %70 : vector<8x128xf32>
    %cst_38 = arith.constant dense<0xFF800000> : vector<128xf32>
    %72 = vector.multi_reduction <maximumf>, %71, %cst_38 [0] : vector<8x128xf32> to vector<128xf32>
    %73 = vector.shape_cast %72 : vector<128xf32> to vector<1x128xf32>
    %74 = arith.maximumf %36, %73 : vector<1x128xf32>
    %75 = arith.addf %34, %61 : vector<8x64xf32>
    %76 = arith.subf %32, %61 : vector<8x64xf32>
    %77 = arith.truncf %76 : vector<8x64xf32> to vector<8x64xbf16>
    %c1 = arith.constant 1 : index
    %c0_39 = arith.constant 0 : index
    %c0_40 = arith.constant 0 : index
    %78 = vector.load %arg9[%c1, %c0_39, %c0_40] : memref<2x128x64xbf16, #tpu.memory_space<vmem>>, vector<1x128x64xbf16>
    %79 = vector.shape_cast %78 : vector<1x128x64xbf16> to vector<128x64xbf16>
    %cst_41 = arith.constant dense<0.000000e+00> : vector<8x128xf32>
    %80 = tpu.matmul %77, %79, %cst_41 {dimension_numbers = #tpu.dot_dimension_numbers<[1], [1], [0], [0], [0, 0, 1, 0], [], []>} : vector<8x64xbf16>, vector<128x64xbf16>, vector<8x128xf32> -> vector<8x128xf32>
    %c1_42 = arith.constant 1 : index
    %c0_43 = arith.constant 0 : index
    %c0_44 = arith.constant 0 : index
    %81 = vector.load %arg10[%c1_42, %c0_43, %c0_44] : memref<2x1x128xf32, #tpu.memory_space<vmem>>, vector<1x1x128xf32>
    %82 = vector.shape_cast %81 : vector<1x1x128xf32> to vector<1x128xf32>
    %cst_45 = arith.constant 2.000000e+00 : f32
    %83 = vector.broadcast %cst_45 : f32 to vector<8x128xf32>
    %84 = arith.mulf %83, %80 : vector<8x128xf32>
    %85 = vector.broadcast %82 : vector<1x128xf32> to vector<8x128xf32>
    %86 = arith.subf %85, %84 : vector<8x128xf32>
    %cst_46 = arith.constant dense<0x7F800000> : vector<8xf32>
    %87 = vector.multi_reduction <minimumf>, %86, %cst_46 [1] : vector<8x128xf32> to vector<8xf32>
    %88 = vector.shape_cast %87 : vector<8xf32> to vector<8x1xf32>
    %89 = vector.broadcast %88 : vector<8x1xf32> to vector<8x128xf32>
    %90 = arith.cmpf ole, %86, %89 : vector<8x128xf32>
    %c128_i32_47 = arith.constant 128 : i32
    %91 = vector.broadcast %c128_i32_47 : i32 to vector<8x128xi32>
    %92 = arith.select %90, %33, %91 : vector<8x128xi1>, vector<8x128xi32>
    %cst_48 = arith.constant dense<2147483647> : vector<8xi32>
    %93 = vector.multi_reduction <minsi>, %92, %cst_48 [1] : vector<8x128xi32> to vector<8xi32>
    %94 = vector.shape_cast %93 : vector<8xi32> to vector<8x1xi32>
    %95 = vector.broadcast %94 : vector<8x1xi32> to vector<8x128xi32>
    %96 = arith.cmpi eq, %33, %95 : vector<8x128xi32>
    %97 = arith.extui %96 : vector<8x128xi1> to vector<8x128xi32>
    %98 = arith.sitofp %97 : vector<8x128xi32> to vector<8x128xf32>
    %c1_49 = arith.constant 1 : index
    %c0_50 = arith.constant 0 : index
    %c0_51 = arith.constant 0 : index
    %99 = vector.load %arg8[%c1_49, %c0_50, %c0_51] : memref<2x128x64xf32, #tpu.memory_space<vmem>>, vector<1x128x64xf32>
    %100 = vector.shape_cast %99 : vector<1x128x64xf32> to vector<128x64xf32>
    %cst_52 = arith.constant dense<0.000000e+00> : vector<8x64xf32>
    %101 = tpu.matmul %98, %100, %cst_52 {dimension_numbers = #tpu.dot_dimension_numbers<[1], [0], [0], [1], [0, 0, 1, 1], [], []>} : vector<8x128xf32>, vector<128x64xf32>, vector<8x64xf32> -> vector<8x64xf32>
    %102 = arith.subf %101, %76 : vector<8x64xf32>
    %103 = arith.mulf %102, %102 : vector<8x64xf32>
    %cst_53 = arith.constant dense<0.000000e+00> : vector<8xf32>
    %104 = vector.multi_reduction <add>, %103, %cst_53 [1] : vector<8x64xf32> to vector<8xf32>
    %105 = vector.shape_cast %104 : vector<8xf32> to vector<8x1xf32>
    %106 = arith.mulf %105, %7 : vector<8x1xf32>
    %cst_54 = arith.constant dense<0.000000e+00> : vector<1xf32>
    %107 = vector.multi_reduction <add>, %106, %cst_54 [0] : vector<8x1xf32> to vector<1xf32>
    %108 = vector.shape_cast %107 : vector<1xf32> to vector<1x1xf32>
    %109 = arith.addf %69, %108 : vector<1x1xf32>
    %110 = vector.broadcast %7 : vector<8x1xf32> to vector<8x128xf32>
    %111 = arith.mulf %98, %110 : vector<8x128xf32>
    %cst_55 = arith.constant dense<0xFF800000> : vector<128xf32>
    %112 = vector.multi_reduction <maximumf>, %111, %cst_55 [0] : vector<8x128xf32> to vector<128xf32>
    %113 = vector.shape_cast %112 : vector<128xf32> to vector<1x128xf32>
    %114 = arith.maximumf %74, %113 : vector<1x128xf32>
    %115 = arith.addf %75, %101 : vector<8x64xf32>
    %116 = tpu.concatenate %54, %94 in 1 : vector<8x1xi32>, vector<8x1xi32> -> vector<8x2xi32>
    %c0_56 = arith.constant 0 : index
    %c0_57 = arith.constant 0 : index
    %117 = vector.load %arg18[%c0_56, %c0_57] : memref<8x2xi32, #tpu.memory_space<vmem>>, vector<8x2xi32>
    tpu.vector_store %arg18[%c0_56, %c0_57], %116 {strides = array<i32>} : memref<8x2xi32, #tpu.memory_space<vmem>>, vector<8x2xi32>,
    %118 = arith.truncf %115 : vector<8x64xf32> to vector<8x64xbf16>
    %c0_58 = arith.constant 0 : index
    %c0_59 = arith.constant 0 : index
    %119 = vector.load %arg11[%c0_58, %c0_59] : memref<64x32xbf16, #tpu.memory_space<vmem>>, vector<64x32xbf16>
    %cst_60 = arith.constant dense<0.000000e+00> : vector<8x32xf32>
    %120 = tpu.matmul %118, %119, %cst_60 {dimension_numbers = #tpu.dot_dimension_numbers<[1], [0], [0], [1], [0, 0, 1, 1], [], []>} : vector<8x64xbf16>, vector<64x32xbf16>, vector<8x32xf32> -> vector<8x32xf32>
    %c0_61 = arith.constant 0 : index
    %c0_62 = arith.constant 0 : index
    %121 = vector.load %arg12[%c0_61, %c0_62] : memref<1x32xf32, #tpu.memory_space<vmem>>, vector<1x32xf32>
    %122 = vector.broadcast %121 : vector<1x32xf32> to vector<8x32xf32>
    %123 = arith.addf %120, %122 : vector<8x32xf32>
    %cst_63 = arith.constant 0.000000e+00 : f32
    %124 = vector.broadcast %cst_63 : f32 to vector<8x32xf32>
    %125 = arith.maximumf %123, %124 : vector<8x32xf32>
    %126 = arith.truncf %125 : vector<8x32xf32> to vector<8x32xbf16>
    %c0_64 = arith.constant 0 : index
    %c0_65 = arith.constant 0 : index
    %127 = vector.load %arg13[%c0_64, %c0_65] : memref<32x32xbf16, #tpu.memory_space<vmem>>, vector<32x32xbf16>
    %cst_66 = arith.constant dense<0.000000e+00> : vector<8x32xf32>
    %128 = tpu.matmul %126, %127, %cst_66 {dimension_numbers = #tpu.dot_dimension_numbers<[1], [0], [0], [1], [0, 0, 1, 1], [], []>} : vector<8x32xbf16>, vector<32x32xbf16>, vector<8x32xf32> -> vector<8x32xf32>
    %c0_67 = arith.constant 0 : index
    %c0_68 = arith.constant 0 : index
    %129 = vector.load %arg14[%c0_67, %c0_68] : memref<1x32xf32, #tpu.memory_space<vmem>>, vector<1x32xf32>
    %130 = vector.broadcast %129 : vector<1x32xf32> to vector<8x32xf32>
    %131 = arith.addf %128, %130 : vector<8x32xf32>
    %cst_69 = arith.constant 0.000000e+00 : f32
    %132 = vector.broadcast %cst_69 : f32 to vector<8x32xf32>
    %133 = arith.maximumf %131, %132 : vector<8x32xf32>
    %134 = arith.truncf %133 : vector<8x32xf32> to vector<8x32xbf16>
    %c0_70 = arith.constant 0 : index
    %c0_71 = arith.constant 0 : index
    %135 = vector.load %arg15[%c0_70, %c0_71] : memref<32x7xbf16, #tpu.memory_space<vmem>>, vector<32x7xbf16>
    %cst_72 = arith.constant dense<0.000000e+00> : vector<8x7xf32>
    %136 = tpu.matmul %134, %135, %cst_72 {dimension_numbers = #tpu.dot_dimension_numbers<[1], [0], [0], [1], [0, 0, 1, 1], [], []>} : vector<8x32xbf16>, vector<32x7xbf16>, vector<8x7xf32> -> vector<8x7xf32>
    %c0_73 = arith.constant 0 : index
    %c0_74 = arith.constant 0 : index
    %137 = vector.load %arg16[%c0_73, %c0_74] : memref<1x7xf32, #tpu.memory_space<vmem>>, vector<1x7xf32>
    %138 = vector.broadcast %137 : vector<1x7xf32> to vector<8x7xf32>
    %139 = arith.addf %136, %138 : vector<8x7xf32>
    %c0_75 = arith.constant 0 : index
    %c0_76 = arith.constant 0 : index
    %140 = vector.load %arg17[%c0_75, %c0_76] : memref<8x7xf32, #tpu.memory_space<vmem>>, vector<8x7xf32>
    tpu.vector_store %arg17[%c0_75, %c0_76], %139 {strides = array<i32>} : memref<8x7xf32, #tpu.memory_space<vmem>>, vector<8x7xf32>,
    %141 = arith.subf %10, %139 : vector<8x7xf32>
    %142 = math.absf %141 : vector<8x7xf32>
    %143 = vector.broadcast %7 : vector<8x1xf32> to vector<8x7xf32>
    %144 = arith.mulf %142, %143 : vector<8x7xf32>
    %cst_77 = arith.constant dense<0.000000e+00> : vector<8xf32>
    %145 = vector.multi_reduction <add>, %144, %cst_77 [1] : vector<8x7xf32> to vector<8xf32>
    %146 = vector.shape_cast %145 : vector<8xf32> to vector<8x1xf32>
    %cst_78 = arith.constant dense<0.000000e+00> : vector<1xf32>
    %147 = vector.multi_reduction <add>, %146, %cst_78 [0] : vector<8x1xf32> to vector<1xf32>
    %148 = vector.shape_cast %147 : vector<1xf32> to vector<1x1xf32>
    %cst_79 = arith.constant 0.000000e+00 : f32
    %149 = vector.broadcast %cst_79 : f32 to vector<1x128xf32>
    %150 = vector.broadcast %148 : vector<1x1xf32> to vector<1x128xf32>
    %151 = arith.addf %150, %149 : vector<1x128xf32>
    %c0_80 = arith.constant 0 : index
    %c0_81 = arith.constant 0 : index
    %c0_82 = arith.constant 0 : index
    %152 = vector.load %arg20[%c0_80, %c0_81, %c0_82] : memref<1x1x128xf32, #tpu.memory_space<vmem>>, vector<1x1x128xf32>
    %153 = vector.shape_cast %152 : vector<1x1x128xf32> to vector<1x128xf32>
    %154 = vector.shape_cast %151 : vector<1x128xf32> to vector<1x1x128xf32>
    tpu.vector_store %arg20[%c0_80, %c0_81, %c0_82], %154 {strides = array<i32>} : memref<1x1x128xf32, #tpu.memory_space<vmem>>, vector<1x1x128xf32>,
    %155 = vector.broadcast %109 : vector<1x1xf32> to vector<1x128xf32>
    %156 = arith.addf %155, %149 : vector<1x128xf32>
    %c0_83 = arith.constant 0 : index
    %c0_84 = arith.constant 0 : index
    %c0_85 = arith.constant 0 : index
    %157 = vector.load %arg21[%c0_83, %c0_84, %c0_85] : memref<1x1x128xf32, #tpu.memory_space<vmem>>, vector<1x1x128xf32>
    %158 = vector.shape_cast %157 : vector<1x1x128xf32> to vector<1x128xf32>
    %159 = vector.shape_cast %156 : vector<1x128xf32> to vector<1x1x128xf32>
    tpu.vector_store %arg21[%c0_83, %c0_84, %c0_85], %159 {strides = array<i32>} : memref<1x1x128xf32, #tpu.memory_space<vmem>>, vector<1x1x128xf32>,
    %c0_86 = arith.constant 0 : index
    %c0_87 = arith.constant 0 : index
    %c0_88 = arith.constant 0 : index
    %160 = vector.load %arg19[%c0_86, %c0_87, %c0_88] : memref<1x1x128xf32, #tpu.memory_space<vmem>>, vector<1x1x128xf32>
    %161 = vector.shape_cast %160 : vector<1x1x128xf32> to vector<1x128xf32>
    %162 = vector.shape_cast %114 : vector<1x128xf32> to vector<1x1x128xf32>
    tpu.vector_store %arg19[%c0_86, %c0_87, %c0_88], %162 {strides = array<i32>} : memref<1x1x128xf32, #tpu.memory_space<vmem>>, vector<1x1x128xf32>,
    return
  }
  func.func @transform_0(%arg0: i32) -> (i32, i32) {
    %c0_i32 = arith.constant 0 : i32
    %c0_i32_0 = arith.constant 0 : i32
    return %arg0, %c0_i32 : i32, i32
  }
  func.func @transform_1(%arg0: i32) -> (i32, i32) {
    %c0_i32 = arith.constant 0 : i32
    %c0_i32_0 = arith.constant 0 : i32
    %c0_i32_1 = arith.constant 0 : i32
    return %c0_i32, %c0_i32_0 : i32, i32
  }
  func.func @transform_2(%arg0: i32) -> (i32, i32) {
    %c0_i32 = arith.constant 0 : i32
    %c0_i32_0 = arith.constant 0 : i32
    %c0_i32_1 = arith.constant 0 : i32
    return %c0_i32, %c0_i32_0 : i32, i32
  }
  func.func @transform_3(%arg0: i32) -> (i32, i32) {
    %c0_i32 = arith.constant 0 : i32
    %c0_i32_0 = arith.constant 0 : i32
    %c0_i32_1 = arith.constant 0 : i32
    return %c0_i32, %c0_i32_0 : i32, i32
  }
  func.func @transform_4(%arg0: i32) -> (i32, i32) {
    %c0_i32 = arith.constant 0 : i32
    %c0_i32_0 = arith.constant 0 : i32
    %c0_i32_1 = arith.constant 0 : i32
    return %c0_i32, %c0_i32_0 : i32, i32
  }
  func.func @transform_5(%arg0: i32) -> (i32, i32) {
    %c0_i32 = arith.constant 0 : i32
    %c0_i32_0 = arith.constant 0 : i32
    %c0_i32_1 = arith.constant 0 : i32
    return %c0_i32, %c0_i32_0 : i32, i32
  }
  func.func @transform_6(%arg0: i32) -> (i32, i32) {
    %c0_i32 = arith.constant 0 : i32
    %c0_i32_0 = arith.constant 0 : i32
    %c0_i32_1 = arith.constant 0 : i32
    return %c0_i32, %c0_i32_0 : i32, i32
  }
  func.func @transform_7(%arg0: i32) -> (i32, i32, i32) {
    %c0_i32 = arith.constant 0 : i32
    %c0_i32_0 = arith.constant 0 : i32
    %c0_i32_1 = arith.constant 0 : i32
    %c0_i32_2 = arith.constant 0 : i32
    return %c0_i32, %c0_i32_0, %c0_i32_1 : i32, i32, i32
  }
  func.func @transform_8(%arg0: i32) -> (i32, i32, i32) {
    %c0_i32 = arith.constant 0 : i32
    %c0_i32_0 = arith.constant 0 : i32
    %c0_i32_1 = arith.constant 0 : i32
    %c0_i32_2 = arith.constant 0 : i32
    return %c0_i32, %c0_i32_0, %c0_i32_1 : i32, i32, i32
  }
  func.func @transform_9(%arg0: i32) -> (i32, i32, i32) {
    %c0_i32 = arith.constant 0 : i32
    %c0_i32_0 = arith.constant 0 : i32
    %c0_i32_1 = arith.constant 0 : i32
    %c0_i32_2 = arith.constant 0 : i32
    return %c0_i32, %c0_i32_0, %c0_i32_1 : i32, i32, i32
  }
  func.func @transform_10(%arg0: i32) -> (i32, i32) {
    %c0_i32 = arith.constant 0 : i32
    %c0_i32_0 = arith.constant 0 : i32
    %c0_i32_1 = arith.constant 0 : i32
    return %c0_i32, %c0_i32_0 : i32, i32
  }
  func.func @transform_11(%arg0: i32) -> (i32, i32) {
    %c0_i32 = arith.constant 0 : i32
    %c0_i32_0 = arith.constant 0 : i32
    %c0_i32_1 = arith.constant 0 : i32
    return %c0_i32, %c0_i32_0 : i32, i32
  }
  func.func @transform_12(%arg0: i32) -> (i32, i32) {
    %c0_i32 = arith.constant 0 : i32
    %c0_i32_0 = arith.constant 0 : i32
    %c0_i32_1 = arith.constant 0 : i32
    return %c0_i32, %c0_i32_0 : i32, i32
  }
  func.func @transform_13(%arg0: i32) -> (i32, i32) {
    %c0_i32 = arith.constant 0 : i32
    %c0_i32_0 = arith.constant 0 : i32
    %c0_i32_1 = arith.constant 0 : i32
    return %c0_i32, %c0_i32_0 : i32, i32
  }
  func.func @transform_14(%arg0: i32) -> (i32, i32) {
    %c0_i32 = arith.constant 0 : i32
    %c0_i32_0 = arith.constant 0 : i32
    %c0_i32_1 = arith.constant 0 : i32
    return %c0_i32, %c0_i32_0 : i32, i32
  }
  func.func @transform_15(%arg0: i32) -> (i32, i32) {
    %c0_i32 = arith.constant 0 : i32
    %c0_i32_0 = arith.constant 0 : i32
    %c0_i32_1 = arith.constant 0 : i32
    return %c0_i32, %c0_i32_0 : i32, i32
  }
  func.func @transform_16(%arg0: i32) -> (i32, i32) {
    %c0_i32 = arith.constant 0 : i32
    %c0_i32_0 = arith.constant 0 : i32
    return %arg0, %c0_i32 : i32, i32
  }
  func.func @transform_17(%arg0: i32) -> (i32, i32) {
    %c0_i32 = arith.constant 0 : i32
    %c0_i32_0 = arith.constant 0 : i32
    return %arg0, %c0_i32 : i32, i32
  }
  func.func @transform_18(%arg0: i32) -> (i32, i32, i32) {
    %c0_i32 = arith.constant 0 : i32
    %c0_i32_0 = arith.constant 0 : i32
    %c0_i32_1 = arith.constant 0 : i32
    return %arg0, %c0_i32, %c0_i32_0 : i32, i32, i32
  }
  func.func @transform_19(%arg0: i32) -> (i32, i32, i32) {
    %c0_i32 = arith.constant 0 : i32
    %c0_i32_0 = arith.constant 0 : i32
    %c0_i32_1 = arith.constant 0 : i32
    return %arg0, %c0_i32, %c0_i32_0 : i32, i32, i32
  }
  func.func @transform_20(%arg0: i32) -> (i32, i32, i32) {
    %c0_i32 = arith.constant 0 : i32
    %c0_i32_0 = arith.constant 0 : i32
    %c0_i32_1 = arith.constant 0 : i32
    return %arg0, %c0_i32, %c0_i32_0 : i32, i32, i32
  }
}

</mosaic_0001>

<bundles_post_ra>
// kernel: tpu_custom_call.1
= control target key start
LH: loop header
LB: loop body
LE: loop exit
PB: predicated region body
PF: predicated region fallthrough
CT: control target
= control target key end

     0   :  { %s2099_s0 = inlined_call_operand.vmem [shape: f32[8,7], index: 0, kind: input, shape index: {}]   ;;  %s2100_s1 = inlined_call_operand.vmem [shape: bf16[7,32], index: 1, kind: input, shape index: {}]   ;;  %s2101_s2 = inlined_call_operand.vmem [shape: f32[1,32], index: 2, kind: input, shape index: {}]   ;;  %s2102_s3 = inlined_call_operand.vmem [shape: bf16[32,32], index: 3, kind: input, shape index: {}]   ;;  %s2103_s4 = inlined_call_operand.vmem [shape: f32[1,32], index: 4, kind: input, shape index: {}]   ;;  %s2104_s5 = inlined_call_operand.vmem [shape: bf16[32,64], index: 5, kind: input, shape index: {}]   ;;  %s2105_s6 = inlined_call_operand.vmem [shape: f32[1,64], index: 6, kind: input, shape index: {}]   ;;  %s2106_s7 = inlined_call_operand.vmem [shape: f32[2,128,64], index: 7, kind: input, shape index: {}]   ;;  %s2107_s8 = inlined_call_operand.vmem [shape: bf16[2,128,64], index: 8, kind: input, shape index: {}]   ;;  %s2108_s9 = inlined_call_operand.vmem [shape: f32[2,1,128], index: 9, kind: input, shape index: {}]   ;;  %s2109_s10 = inlined_call_operand.vmem [shape: bf16[64,32], index: 10, kind: input, shape index: {}]   ;;  %s2110_s11 = inlined_call_operand.vmem [shape: f32[1,32], index: 11, kind: input, shape index: {}]   ;;  %s2111_s12 = inlined_call_operand.vmem [shape: bf16[32,32], index: 12, kind: input, shape index: {}]   ;;  %s2112_s13 = inlined_call_operand.vmem [shape: f32[1,32], index: 13, kind: input, shape index: {}]   ;;  %s2113_s14 = inlined_call_operand.vmem [shape: bf16[32,7], index: 14, kind: input, shape index: {}]   ;;  %s2114_s15 = inlined_call_operand.vmem [shape: f32[1,7], index: 15, kind: input, shape index: {}]   ;;  %s2115_s16 = inlined_call_operand.hbm [shape: f32[8,7], index: 16, kind: output, shape index: {0}]   ;;  %s2116_s17 = inlined_call_operand.vmem [shape: s32[8,2], index: 17, kind: output, shape index: {1}]   ;;  %s2117_s18 = inlined_call_operand.hbm [shape: f32[1,1,128], index: 18, kind: output, shape index: {2}]   ;;  %s2118_s19 = inlined_call_operand.hbm [shape: f32[1,1,128], index: 19, kind: output, shape index: {3}]   ;;  %s2119_s20 = inlined_call_operand.hbm [shape: f32[1,1,128], index: 20, kind: output, shape index: {4}]  }
   0x1   :  { %2121 = sst [smem:[#allocation12_spill]] %s2099_s0 }
   0x2   :  { %2122 = sst [smem:[#allocation13_spill]] %s2100_s1 }
   0x3   :  { %2123 = sst [smem:[#allocation14_spill]] %s2101_s2 }
   0x4   :  { %2124 = sst [smem:[#allocation15_spill]] %s2102_s3 }
   0x5   :  { %2125 = sst [smem:[#allocation16_spill]] %s2103_s4 }
   0x6   :  { %26 = vsyncpa [#allocation3], 0 }
   0x7   :  { %27 = vsyncpa [#allocation5], 0  ;;  %s2126_s23 = sld [smem:[#allocation13_spill]]  ;;  %vm84_vm0 = vcmask 1042432   ;;  %vm85_vm1 = vcmask 1043456   ;;  %v1590_v1 = vmov 0.0  }
   0x8   :  { %1251 = vmatprep.subr.bf16.mxu0 %v1590_v1  ;;  %v1591_v2 = vmov 65535   ;;  %s2127_s25 = sld [smem:[#allocation12_spill]]  ;;  %1257 = vmatprep.subr.bf16.mxu1 %v1590_v1  ;;  %vm1592_vm2 = vmmov 0   ;;  %vm80_vm3 = vcmask 56320  }
   0x9   :  { %v86_v3 = vsel %vm84_vm0, 4294967295, %v1591_v2  ;;  %1253 = vmatprep.mubr.msk.bf16.mxu0 %vm1592_vm2, %v1590_v1  ;;  %1261 = vmatprep.mubr.msk.bf16.mxu1 %vm1592_vm2, %v1590_v1 }
   0xa   :  { %v87_v5 = vsel %vm85_vm1, %v86_v3, 0 }
   0xd   :  { %v72_v0 = vld [vmem:[%s2126_s23] sm:$0xf] }
   0xe   :  { %v1711_v4 = vld [vmem:[%s2127_s25] sm:$0xff]  ;;  %v89_v6 = vand.u32 %v87_v5, %v72_v0 }
   0xf   :  { %v71_v7 = vpack.c.bf16 %v1711_v4, %v1711_v4 }
  0x10   :  { %1252 = vmatpush3.bf16.msra.mxu0 %v89_v6 }
  0x11   :  { %1265 = vmatprep.subr.bf16.mxu0 %v1590_v1 }
  0x13   :  { %1254 = vmatmul.mubr.msk.bf16.vlgmr.msra.gmra.mrb[0].mxu0 %vm80_vm3, %v71_v7 }
  0x14   :  { %1269 = vmatprep.mubr.msk.bf16.mxu0 %vm1592_vm2, %v1590_v1 }
  0x15   :  { %28 = vsyncpa [#allocation8], 0  ;;  %s2128_s27 = sld [smem:[#allocation15_spill]]  ;;  %v1470_v10 = vld [vmem:[%s2104_s5] sm:$0xff]   ;;  %s2129_s1 = sld [smem:[#allocation14_spill]]  ;;  %vm156_vm4 = vcmask 261120   ;;  %v268_v58 = vlaneseq }
  0x16   :  { %1266 = vmatpush3.bf16.msra.mxu0 %v1470_v10  ;;  %v1471_v19 = vld [vmem:[%s2104_s5 + $0x8] sm:$0xff]   ;;  %v1472_v20 = vld [vmem:[%s2107_s8] sm:$0xff]   ;;  %vm327_vm5 = vcmask 523264   ;;  %v1474_v24 = vld [vmem:[%s2107_s8 + $0x10] sm:$0xff]   ;;  %s2130_s25 = sld [smem:[#allocation16_spill]]  ;;  %v1593_v5 = vmov 0.0|0.0  }
  0x17   :  { %1267 = vmatprep.subr.bf16.mxu0 %v1590_v1  ;;  %v332_v21 = vsel %vm327_vm5, %v1472_v20, 0  ;;  %v1473_v22 = vld [vmem:[%s2107_s8 + $0x8] sm:$0xff]   ;;  %v338_v25 = vsel %vm327_vm5, %v1474_v24, 0  ;;  %v1475_v26 = vld [vmem:[%s2107_s8 + $0x18] sm:$0xff]   ;;  %v1476_v28 = vld [vmem:[%s2107_s8 + $0x20] sm:$0xff]   ;;  %v1803_v59 = vand.u32 127, %v268_v58 }
  0x18   :  { %v335_v23 = vsel %vm327_vm5, %v1473_v22, 0  ;;  %v341_v27 = vsel %vm327_vm5, %v1475_v26, 0  ;;  %v344_v29 = vsel %vm327_vm5, %v1476_v28, 0  ;;  %v1477_v30 = vld [vmem:[%s2107_s8 + $0x28] sm:$0xff]   ;;  %v1478_v32 = vld [vmem:[%s2107_s8 + $0x30] sm:$0xff]   ;;  %v1479_v34 = vld [vmem:[%s2107_s8 + $0x38] sm:$0xff]  }
  0x19   :  { %v347_v31 = vsel %vm327_vm5, %v1477_v30, 0  ;;  %v350_v33 = vsel %vm327_vm5, %v1478_v32, 0  ;;  %v353_v35 = vsel %vm327_vm5, %v1479_v34, 0  ;;  %v1105_v44 = vld [vmem:[%s2105_s6] ss:$0 sm:$0xff]  ;;  %v426_v2 = vld [vmem:[%s2106_s7 + $0x8] sm:$0xff] }
  0x1a   :  { %1268 = vmatpush3.bf16.msra.mxu0 %v1471_v19  ;;  %v1118_v52 = vld [vmem:[%s2108_s9] ss:$0 sm:$0xff]  ;;  %v427_v3 = vld [vmem:[%s2106_s7 + $0x10] sm:$0xff]  ;;  %v428_v7 = vld [vmem:[%s2106_s7 + $0x18] sm:$0xff]  ;;  %vm799_vm11 = vcmask 7168   ;;  %vm801_vm12 = vcmask 15360  }
  0x1b   :  { %v1468_v8 = vld [vmem:[%s2128_s27] sm:$0xff]   ;;  %v1469_v9 = vld [vmem:[%s2128_s27 + $0x8] sm:$0xff]   ;;  %1411 = vmatprep.subr.bf16.mxu0 %v1593_v5  ;;  %v436_v19 = vld [vmem:[%s2106_s7 + $0x58] sm:$0xff] }
  0x1c   :  { %1258 = vmatpush3.bf16.msra.mxu1 %v1468_v8  ;;  %v1099_v11 = vld [vmem:[%s2129_s1] ss:$0 sm:$0xff]  ;;  %v1415_v8 = vpack.c.bf16 %v428_v7, %v427_v3  ;;  %v430_v10 = vld [vmem:[%s2106_s7 + $0x28] sm:$0xff]  ;;  %v439_v28 = vld [vmem:[%s2106_s7 + $0x70] sm:$0xff] }
  0x1d   :  { %1259 = vmatprep.subr.bf16.mxu1 %v1590_v1  ;;  %v1101_v36 = vld [vmem:[%s2130_s25] ss:$0 sm:$0xff]  ;;  %v438_v22 = vld [vmem:[%s2106_s7 + $0x68] sm:$0xff] }
  0x1e   :  { %v425_v0 = vld [vmem:[%s2106_s7] sm:$0xff] }
  0x1f   :  { %v1412_v6 = vpack.c.bf16 %v426_v2, %v425_v0 }
  0x20   :  { %1260 = vmatpush3.bf16.msra.mxu1 %v1469_v9  ;;  %v429_v9 = vld [vmem:[%s2106_s7 + $0x20] sm:$0xff] }
  0x21   :  { %1273 = vmatprep.subr.bf16.mxu1 %v1590_v1 }
  0xe6   :  { %v125_v12 = vpop.f32.mrb[0].mxu0 }
  0xe7   :  { %v126_v13 = vadd.f32 %v1099_v11, %v125_v12  ;;  %v1255_v14 = vpop.f32.mrb[1].mxu0  ;;  %v1418_v11 = vpack.c.bf16 %v430_v10, %v429_v9  ;;  %v431_v12 = vld [vmem:[%s2106_s7 + $0x30] sm:$0xff] }
  0xe8   :  { %v128_v15 = vpop.f32.mrb[2].mxu0 }
  0xe9   :  { %v131_v16 = vmax.f32 %v126_v13, 0.0  ;;  %v1256_v17 = vpop.f32.mrb[3].mxu0  ;;  %v432_v13 = vld [vmem:[%s2106_s7 + $0x38] sm:$0xff]  ;;  %v433_v15 = vld [vmem:[%s2106_s7 + $0x40] sm:$0xff] }
  0xea   :  { %v1421_v14 = vpack.c.bf16 %v432_v13, %v431_v12  ;;  %v1149_v12 = vld [vmem:[%s2106_s7 + $0x80] sm:$0xff]  ;;  %v1150_v13 = vld [vmem:[%s2106_s7 + $0x88] sm:$0xff] }
  0xeb   :  { %v132_v18 = vpack.c.bf16 %v131_v16, %v131_v16  ;;  %v434_v16 = vld [vmem:[%s2106_s7 + $0x48] sm:$0xff] }
  0xec   :  { %v1424_v17 = vpack.c.bf16 %v434_v16, %v433_v15  ;;  %v1152_v15 = vld [vmem:[%s2106_s7 + $0x98] sm:$0xff] }
  0xed   :  { %1262 = vmatmul.mubr.msk.bf16.vlgmr.msra.gmra.mrb[0].mxu1 %vm156_vm4, %v132_v18  ;;  %v435_v18 = vld [vmem:[%s2106_s7 + $0x50] sm:$0xff] }
  0xee   :  { %1289 = vmatprep.mubr.msk.bf16.mxu1 %vm1592_vm2, %v1590_v1  ;;  %1274 = vmatpush3.bf16.xpose.msra.mxu1 %v332_v21  ;;  %v1427_v20 = vpack.c.bf16 %v436_v19, %v435_v18  ;;  %v437_v21 = vld [vmem:[%s2106_s7 + $0x60] sm:$0xff]  ;;  %v1154_v18 = vld [vmem:[%s2106_s7 + $0xa8] sm:$0xff] }
  0xef   :  { %1275 = vmatprep.subr.bf16.mxu1 %v1590_v1 }
  0xf6   :  { %1276 = vmatpush3.bf16.xpose.msra.mxu1 %v335_v23  ;;  %v1430_v23 = vpack.c.bf16 %v438_v22, %v437_v21  ;;  %v1156_v21 = vld [vmem:[%s2106_s7 + $0xb8] sm:$0xff] }
  0xf7   :  { %1277 = vmatprep.subr.bf16.mxu1 %v1590_v1 }
  0xfe   :  { %1278 = vmatpush3.bf16.xpose.msra.mxu1 %v338_v25 }
  0xff   :  { %1279 = vmatprep.subr.bf16.mxu1 %v1590_v1 }
 0x106   :  { %1280 = vmatpush3.bf16.xpose.msra.mxu1 %v341_v27 }
 0x107   :  { %1281 = vmatprep.subr.bf16.mxu1 %v1590_v1 }
 0x10e   :  { %1282 = vmatpush3.bf16.xpose.msra.mxu1 %v344_v29  ;;  %v440_v29 = vld [vmem:[%s2106_s7 + $0x78] sm:$0xff] }
 0x10f   :  { %1283 = vmatprep.subr.bf16.mxu1 %v1590_v1  ;;  %v1433_v30 = vpack.c.bf16 %v440_v29, %v439_v28  ;;  %v1161_v29 = vld [vmem:[%s2106_s7 + $0xe0] sm:$0xff] }
 0x116   :  { %1284 = vmatpush3.bf16.xpose.msra.mxu1 %v347_v31 }
 0x117   :  { %1285 = vmatprep.subr.bf16.mxu1 %v1590_v1 }
 0x11e   :  { %1286 = vmatpush3.bf16.xpose.msra.mxu1 %v350_v33  ;;  %v1480_v33 = vld [vmem:[%s2107_s8 + $0x40] sm:$0xff]  }
 0x11f   :  { %1287 = vmatprep.subr.bf16.mxu1 %v1590_v1 }
 0x126   :  { %1288 = vmatpush3.bf16.xpose.msra.mxu1 %v353_v35 }
 0x127   :  { %1435 = vmatprep.subr.bf16.mxu1 %v1593_v5 }
 0x1c0   :  { %v194_v37 = vpop.f32.mrb[0].mxu1 }
 0x1c1   :  { %v195_v38 = vadd.f32 %v1101_v36, %v194_v37  ;;  %v1263_v39 = vpop.f32.mrb[1].mxu1  ;;  %v596_v37 = vsel %vm327_vm5, %v1480_v33, 0 }
 0x1c2   :  { %v197_v40 = vpop.f32.mrb[2].mxu1  ;;  %v1481_v39 = vld [vmem:[%s2107_s8 + $0x48] sm:$0xff]  }
 0x1c3   :  { %v200_v41 = vmax.f32 %v195_v38, 0.0  ;;  %v1264_v42 = vpop.f32.mrb[3].mxu1  ;;  %v1594_v38 = vmov 1.0   ;;  %v599_v40 = vsel %vm327_vm5, %v1481_v39, 0  ;;  %v1164_v39 = vld [vmem:[%s2106_s7 + $0xf8] sm:$0xff] }
 0x1c5   :  { %v201_v43 = vpack.c.bf16 %v200_v41, %v200_v41  ;;  %v1482_v41 = vld [vmem:[%s2107_s8 + $0x50] sm:$0xff]  }
 0x1c6   :  { %v602_v42 = vsel %vm327_vm5, %v1482_v41, 0 }
 0x1c7   :  { %1270 = vmatmul.mubr.msk.bf16.vlgmr.msra.gmra.mrb[4].mxu0 %vm156_vm4, %v201_v43  ;;  %v1483_v43 = vld [vmem:[%s2107_s8 + $0x58] sm:$0xff]  }
 0x1c8   :  { %1325 = vmatprep.mubr.msk.f32.mxu0 %vm1592_vm2, %v1590_v1  ;;  %1413 = vmatpush3.bf16.msra.mxu0 %v1412_v6 }
 0x1c9   :  { %1414 = vmatprep.subr.bf16.mxu0 %v1593_v5 }
 0x1cc   :  { %1416 = vmatpush3.bf16.msra.mxu0 %v1415_v8 }
 0x1cd   :  { %1417 = vmatprep.subr.bf16.mxu0 %v1593_v5 }
 0x1d0   :  { %1419 = vmatpush3.bf16.msra.mxu0 %v1418_v11 }
 0x1d1   :  { %1420 = vmatprep.subr.bf16.mxu0 %v1593_v5 }
 0x1d4   :  { %1422 = vmatpush3.bf16.msra.mxu0 %v1421_v14  ;;  %v1151_v14 = vld [vmem:[%s2106_s7 + $0x90] sm:$0xff] }
 0x1d5   :  { %1423 = vmatprep.subr.bf16.mxu0 %v1593_v5  ;;  %v1439_v16 = vpack.c.bf16 %v1152_v15, %v1151_v14 }
 0x1d8   :  { %1425 = vmatpush3.bf16.msra.mxu0 %v1424_v17  ;;  %v1153_v17 = vld [vmem:[%s2106_s7 + $0xa0] sm:$0xff] }
 0x1d9   :  { %1426 = vmatprep.subr.bf16.mxu0 %v1593_v5  ;;  %v1442_v19 = vpack.c.bf16 %v1154_v18, %v1153_v17 }
 0x1dc   :  { %1428 = vmatpush3.bf16.msra.mxu0 %v1427_v20  ;;  %v1155_v20 = vld [vmem:[%s2106_s7 + $0xb0] sm:$0xff] }
 0x1dd   :  { %1429 = vmatprep.subr.bf16.mxu0 %v1593_v5  ;;  %v1445_v22 = vpack.c.bf16 %v1156_v21, %v1155_v20 }
 0x1e0   :  { %1431 = vmatpush3.bf16.msra.mxu0 %v1430_v23  ;;  %v1157_v23 = vld [vmem:[%s2106_s7 + $0xc0] sm:$0xff] }
 0x1e1   :  { %1432 = vmatprep.subr.bf16.mxu0 %v1593_v5 }
 0x1e4   :  { %1434 = vmatpush3.bf16.msra.mxu0 %v1433_v30  ;;  %v1162_v30 = vld [vmem:[%s2106_s7 + $0xe8] sm:$0xff] }
 0x1e5   :  { %1328 = vmatprep.subr.bf16.mxu0 %v1590_v1 }
 0x29a   :  { %v262_v45 = vpop.f32.mrb[4].mxu0 }
 0x29b   :  { %v1793_v46 = vadd.f32 %v1105_v44, %v262_v45  ;;  %v1271_v47 = vpop.f32.mrb[5].mxu0  ;;  %v605_v44 = vsel %vm327_vm5, %v1483_v43, 0  ;;  %v1484_v45 = vld [vmem:[%s2107_s8 + $0x60] sm:$0xff]  }
 0x29c   :  { %v265_v48 = vpop.f32.mrb[6].mxu0  ;;  %v608_v47 = vsel %vm327_vm5, %v1484_v45, 0 }
 0x29d   :  { %v270_v49 = vpack.c.bf16 %v1793_v46, %v1793_v46  ;;  %v1272_v50 = vpop.f32.mrb[7].mxu0  ;;  %v1485_v48 = vld [vmem:[%s2107_s8 + $0x68] sm:$0xff]  }
 0x29e   :  { %v1486_v50 = vld [vmem:[%s2107_s8 + $0x70] sm:$0xff]  }
 0x29f   :  { %1290 = vmatmul.mubr.msk.bf16.vlgmr.msra.gmra.mrb[4].mxu1 %vm327_vm5, %v270_v49  ;;  %v611_v49 = vsel %vm327_vm5, %v1485_v48, 0 }
 0x2a0   :  { %1380 = vmatprep.mubr.msk.f32.mxu1 %vm1592_vm2, %v1590_v1 }
 0x372   :  { %v389_v51 = vpop.f32.mrb[4].mxu1 }
 0x373   :  { %v396_v53 = vmul.f32 2.0, %v389_v51  ;;  %v1291_v54 = vpop.f32.mrb[5].mxu1  ;;  %v614_v51 = vsel %vm327_vm5, %v1486_v50, 0  ;;  %v1488_v50 = vld [vmem:[%s2109_s10] sm:$0xff]  }
 0x374   :  { %v392_v55 = vpop.f32.mrb[6].mxu1 }
 0x375   :  { %v1292_v56 = vpop.f32.mrb[7].mxu1  ;;  %v403_v57 = vsub.f32 %v1118_v52, %v396_v53  ;;  %v1487_v52 = vld [vmem:[%s2107_s8 + $0x78] sm:$0xff]  }
 0x376   :  { %v617_v53 = vsel %vm327_vm5, %v1487_v52, 0 }
 0x377   :  { %404 = vmin.xlane.f32.xlu0 %v403_v57 }
 0x404   :  { %v405_v60 = vpop.xlane.xlu0 %404 }
 0x405   :  { %vm406_vm6 = vcmp.le.f32.partialorder %v403_v57, %v405_v60  ;;  %v1147_v60 = vld [vmem:[%s2108_s9 + $0x1] ss:$0 sm:$0xff] }
 0x406   :  { %v407_v61 = vsel %vm406_vm6, %v1803_v59, 128 }
 0x407   :  { %v409_v62 = vshra.s32 %v407_v61, 16  ;;  %v408_v24 = vand.u32 65535, %v407_v61 }
 0x409   :  { %v411_v63 = vcvt.s32.f32 %v409_v62  ;;  %v410_v26 = vcvt.s32.f32 %v408_v24  ;;  %v1158_v24 = vld [vmem:[%s2106_s7 + $0xc8] sm:$0xff] }
 0x40b   :  { %412 = vmin.xlane.f32.xlu0 %v411_v63 }
 0x498   :  { %v413_v25 = vpop.xlane.xlu0 %412 }
 0x499   :  { %vm414_vm7 = vcmp.eq.f32.partialorder %v411_v63, %v413_v25  ;;  %v419_v31 = vcvt.f32.s32 %v413_v25  ;;  %v1448_v25 = vpack.c.bf16 %v1158_v24, %v1157_v23 }
 0x49a   :  { %v415_v27 = vsel %vm414_vm7, %v410_v26, inf  ;;  %v1159_v26 = vld [vmem:[%s2106_s7 + $0xd0] sm:$0xff] }
 0x49b   :  { %416 = vmin.xlane.f32.xlu1 %v415_v27  ;;  %v420_v34 = vshll.u32 %v419_v31, 16  ;;  %v1160_v27 = vld [vmem:[%s2106_s7 + $0xd8] sm:$0xff]  ;;  %v1454_v31 = vpack.c.bf16 %v1162_v30, %v1161_v29 }
 0x49c   :  { %v1451_v28 = vpack.c.bf16 %v1160_v27, %v1159_v26  ;;  %v1166_v27 = vld [vmem:[%s2110_s11] ss:$0 sm:$0xff] }
 0x528   :  { %v417_v32 = vpop.xlane.xlu1 %416 }
 0x529   :  { %v418_v35 = vcvt.f32.s32 %v417_v32 }
 0x52b   :  { %v1867_v36 = vadd.s32 %v420_v34, %v418_v35 }
 0x52d   :  { %vm422_vm8 = vcmp.eq.s32.totalorder %v1803_v59, %v1867_v36 }
 0x52e   :  { %1326 = vmatmul.mubr.msk.f32.vlgmr.msra.gmra.mrb[8].mxu0 %vm422_vm8, %v1594_v38 }
 0x52f   :  { %1329 = vmatpush3.bf16.xpose.msra.mxu0 %v596_v37  ;;  %1344 = vmatprep.mubr.msk.bf16.mxu0 %vm1592_vm2, %v1590_v1  ;;  %v1163_v37 = vld [vmem:[%s2106_s7 + $0xf0] sm:$0xff]  ;;  %s1596_s7 = smov [#allocation2]  }
 0x530   :  { %1330 = vmatprep.subr.bf16.mxu0 %v1590_v1  ;;  %s1046_s24 = sshll.u32 %s1596_s7, 4  ;;  %s1047_s24 = int_to_ptr.vmem [resolvable:$true] %s1046_s24 }
 0x537   :  { %1331 = vmatpush3.bf16.xpose.msra.mxu0 %v599_v40  ;;  %v1457_v40 = vpack.c.bf16 %v1164_v39, %v1163_v37  ;;  %v1495_v37 = vld [vmem:[%s2113_s14 + $0x8] sm:$0xff]   ;;  %v1172_v39 = vld [vmem:[%s2112_s13] ss:$0 sm:$0xff]  ;;  %s1595_s13 = smov [#allocation4]  }
 0x538   :  { %1332 = vmatprep.subr.bf16.mxu0 %v1590_v1 }
 0x53f   :  { %1333 = vmatpush3.bf16.xpose.msra.mxu0 %v602_v42 }
 0x540   :  { %1334 = vmatprep.subr.bf16.mxu0 %v1590_v1 }
 0x547   :  { %1335 = vmatpush3.bf16.xpose.msra.mxu0 %v605_v44 }
 0x548   :  { %1336 = vmatprep.subr.bf16.mxu0 %v1590_v1 }
 0x54f   :  { %1337 = vmatpush3.bf16.xpose.msra.mxu0 %v608_v47 }
 0x550   :  { %1338 = vmatprep.subr.bf16.mxu0 %v1590_v1 }
 0x557   :  { %1339 = vmatpush3.bf16.xpose.msra.mxu0 %v611_v49 }
 0x558   :  { %1340 = vmatprep.subr.bf16.mxu0 %v1590_v1 }
 0x55f   :  { %1341 = vmatpush3.bf16.xpose.msra.mxu0 %v614_v51 }
 0x560   :  { %1342 = vmatprep.subr.bf16.mxu0 %v1590_v1 }
 0x567   :  { %1343 = vmatpush3.bf16.xpose.msra.mxu0 %v617_v53 }
 0x568   :  { %1395 = vmatprep.subr.bf16.mxu0 %v1590_v1 }
 0x601   :  { %v1914_v54 = vpop.f32.mrb[8].mxu0 }
 0x602   :  { %v1918_v55 = vsub.f32 %v1793_v46, %v1914_v54  ;;  %v1327_v56 = vpop.f32.mrb[9].mxu0  ;;  %v511_v7 = vsub.f32 %v1914_v54, %v1793_v46  ;;  %v1436_v46 = vpack.c.bf16 %v1150_v13, %v1149_v12  ;;  %v1492_v13 = vld [vmem:[%s2111_s12] sm:$0xff]  }
 0x604   :  { %v534_v57 = vpack.c.bf16 %v1918_v55, %v1918_v55  ;;  %v512_v10 = vmul.f32 %v511_v7, %v511_v7  ;;  %1437 = vmatpush3.bf16.msra.mxu1 %v1436_v46 }
 0x605   :  { %1438 = vmatprep.subr.bf16.mxu1 %v1593_v5 }
 0x606   :  { %1345 = vmatmul.mubr.msk.bf16.vlgmr.msra.gmra.mrb[12].mxu0 %vm327_vm5, %v534_v57  ;;  %v513_v11 = vsel %vm327_vm5, %v512_v10, 0.0  ;;  %v1489_v57 = vld [vmem:[%s2109_s10 + $0x8] sm:$0xff]  }
 0x607   :  { %1399 = vmatprep.mubr.msk.bf16.mxu0 %vm1592_vm2, %v1590_v1  ;;  %1396 = vmatpush3.bf16.msra.mxu0 %v1492_v13 }
 0x608   :  { %1440 = vmatpush3.bf16.msra.mxu1 %v1439_v16  ;;  %1397 = vmatprep.subr.bf16.mxu0 %v1590_v1 }
 0x609   :  { %1441 = vmatprep.subr.bf16.mxu1 %v1593_v5 }
 0x60c   :  { %1443 = vmatpush3.bf16.msra.mxu1 %v1442_v19 }
 0x60d   :  { %1444 = vmatprep.subr.bf16.mxu1 %v1593_v5 }
 0x610   :  { %1446 = vmatpush3.bf16.msra.mxu1 %v1445_v22 }
 0x611   :  { %1447 = vmatprep.subr.bf16.mxu1 %v1593_v5 }
 0x614   :  { %1449 = vmatpush3.bf16.msra.mxu1 %v1448_v25 }
 0x615   :  { %1450 = vmatprep.subr.bf16.mxu1 %v1593_v5 }
 0x618   :  { %1452 = vmatpush3.bf16.msra.mxu1 %v1451_v28 }
 0x619   :  { %1453 = vmatprep.subr.bf16.mxu1 %v1593_v5 }
 0x61c   :  { %1455 = vmatpush3.bf16.msra.mxu1 %v1454_v31 }
 0x61d   :  { %1456 = vmatprep.subr.bf16.mxu1 %v1593_v5  ;;  %v1119_v5 = vsel %vm422_vm8, 1.0, %v1590_v1 }
 0x61e   :  { %v525_v41 = vrot.slane %v1119_v5, 4 }
 0x620   :  { %1458 = vmatpush3.bf16.msra.mxu1 %v1457_v40  ;;  %v526_v42 = vmax.f32 %v1119_v5, %v525_v41 }
 0x621   :  { %1383 = vmatprep.subr.bf16.mxu1 %v1590_v1 }
 0x622   :  { %v527_v48 = vrot.slane %v526_v42, 2 }
 0x624   :  { %v528_v52 = vmax.f32 %v526_v42, %v527_v48 }
 0x6d9   :  { %v653_v58 = vpop.f32.mrb[12].mxu0 }
 0x6da   :  { %v661_v61 = vmul.f32 2.0, %v653_v58  ;;  %v1346_v62 = vpop.f32.mrb[13].mxu0  ;;  %v1490_v58 = vld [vmem:[%s2109_s10 + $0x10] sm:$0xff]  }
 0x6db   :  { %v656_v63 = vpop.f32.mrb[14].mxu0 }
 0x6dc   :  { %v1347_v0 = vpop.f32.mrb[15].mxu0  ;;  %v668_v2 = vsub.f32 %v1147_v60, %v661_v61 }
 0x6de   :  { %669 = vmin.xlane.f32.xlu1 %v668_v2 }
 0x76b   :  { %v670_v3 = vpop.xlane.xlu1 %669 }
 0x76c   :  { %vm671_vm9 = vcmp.le.f32.partialorder %v668_v2, %v670_v3  ;;  %v1491_v3 = vld [vmem:[%s2109_s10 + $0x18] sm:$0xff]  }
 0x76d   :  { %v672_v6 = vsel %vm671_vm9, %v1803_v59, 128 }
 0x76e   :  { %v674_v8 = vshra.s32 %v672_v6, 16  ;;  %v673_v32 = vand.u32 65535, %v672_v6 }
 0x770   :  { %v676_v9 = vcvt.s32.f32 %v674_v8  ;;  %v675_v34 = vcvt.s32.f32 %v673_v32 }
 0x772   :  { %677 = vmin.xlane.f32.xlu0 %v676_v9 }
 0x776   :  { %514 = vadd.xlane.f32.xlu0 %v513_v11 }
 0x7ff   :  { %v678_v33 = vpop.xlane.xlu0 %677 }
 0x800   :  { %vm679_vm10 = vcmp.eq.f32.partialorder %v676_v9, %v678_v33  ;;  %v684_v43 = vcvt.f32.s32 %v678_v33 }
 0x801   :  { %v680_v35 = vsel %vm679_vm10, %v675_v34, inf  ;;  %v1494_v34 = vld [vmem:[%s2113_s14] sm:$0xff]   ;;  %s1058_s14 = sshll.u32 %s1595_s13, 4  ;;  %s1059_s14 = int_to_ptr.vmem [resolvable:$true] %s1058_s14 }
 0x802   :  { %681 = vmin.xlane.f32.xlu1 %v680_v35  ;;  %v685_v45 = vshll.u32 %v684_v43, 16  ;;  %s1500_s2 = scalar_lea.vmem %s1059_s14, 32  ;;  %p1501_p1 = scmp.lt.s32.totalorder %s1059_s14, %s1059_s14 }
 0x88f   :  { %v682_v44 = vpop.xlane.xlu1 %681 }
 0x890   :  { %v683_v47 = vcvt.f32.s32 %v682_v44 }
 0x892   :  { %v686_v49 = vadd.s32 %v685_v45, %v683_v47 }
 0x894   :  { %vm687_vm13 = vcmp.eq.s32.totalorder %v1803_v59, %v686_v49  ;;  %v800_v51 = vsel %vm799_vm11, %v1867_v36, %v686_v49  ;;  %v529_v36 = vrot.slane %v528_v52, 1 }
 0x895   :  { %v1148_v53 = vsel %vm687_vm13, 1.0, %v1590_v1  ;;  %802 = vst.msk [vmem:[%s2116_s17] sm:$0xff] %vm801_vm12, %v800_v51  ;;  %1381 = vmatmul.mubr.msk.f32.vlgmr.msra.gmra.mrb[8].mxu1 %vm687_vm13, %v1594_v38 }
 0x896   :  { %v791_v56 = vrot.slane %v1148_v53, 4  ;;  %1384 = vmatpush3.bf16.msra.mxu1 %v1488_v50  ;;  %1391 = vmatprep.mubr.msk.bf16.mxu1 %vm1592_vm2, %v1590_v1  ;;  %v530_v38 = vmax.f32 %v528_v52, %v529_v36 }
 0x897   :  { %1385 = vmatprep.subr.bf16.mxu1 %v1590_v1 }
 0x898   :  { %v792_v59 = vmax.f32 %v1148_v53, %v791_v56  ;;  %v531_v63 = vmax.f32 %v530_v38, 0.0 }
 0x89a   :  { %1386 = vmatpush3.bf16.msra.mxu1 %v1489_v57  ;;  %v793_v60 = vrot.slane %v792_v59, 2 }
 0x89b   :  { %1387 = vmatprep.subr.bf16.mxu1 %v1590_v1 }
 0x89c   :  { %v794_v61 = vmax.f32 %v792_v59, %v793_v60 }
 0x89e   :  { %1388 = vmatpush3.bf16.msra.mxu1 %v1490_v58  ;;  %v795_v62 = vrot.slane %v794_v61, 1 }
 0x89f   :  { %1389 = vmatprep.subr.bf16.mxu1 %v1590_v1 }
 0x8a0   :  { %v796_v0 = vmax.f32 %v794_v61, %v795_v62 }
 0x8a2   :  { %v797_v2 = vmax.f32 %v531_v63, %v796_v0  ;;  %1390 = vmatpush3.bf16.msra.mxu1 %v1491_v3 }
 0x8a4   :  { %1039 = vst [vmem:[#allocation4] sm:$0x1] %v797_v2 }
 0x968   :  { %v773_v6 = vpop.f32.mrb[8].mxu1 }
 0x969   :  { %v777_v7 = vsub.f32 %v773_v6, %v1918_v55  ;;  %v798_v8 = vadd.f32 %v773_v6, %v1914_v54  ;;  %v1382_v9 = vpop.f32.mrb[9].mxu1  ;;  %v1493_v55 = vld [vmem:[%s2111_s12 + $0x8] sm:$0xff]   ;;  %v515_v54 = vpop.xlane.xlu0 %514 }
 0x96a   :  { %1398 = vmatpush3.bf16.msra.mxu0 %v1493_v55  ;;  %v517_v14 = vrot.slane %v515_v54, 4 }
 0x96b   :  { %v778_v10 = vmul.f32 %v777_v7, %v777_v7  ;;  %v803_v11 = vpack.c.bf16 %v798_v8, %v798_v8  ;;  %1403 = vmatprep.subr.bf16.mxu0 %v1590_v1 }
 0x96c   :  { %v518_v46 = vadd.f32 %v517_v14, %v515_v54 }
 0x96d   :  { %1392 = vmatmul.mubr.msk.bf16.vlgmr.msra.gmra.mrb[12].mxu1 %vm327_vm5, %v803_v11  ;;  %v779_v12 = vsel %vm327_vm5, %v778_v10, 0.0 }
 0x96e   :  { %780 = vadd.xlane.f32.xlu1 %v779_v12  ;;  %v519_v15 = vrot.slane %v518_v46, 2 }
 0x970   :  { %v520_v18 = vadd.f32 %v519_v15, %v518_v46 }
 0x972   :  { %v521_v21 = vrot.slane %v520_v18, 1 }
 0x974   :  { %v522_v24 = vadd.f32 %v521_v21, %v520_v18 }
 0x9fb   :  { %v781_v16 = vpop.xlane.xlu1 %780 }
 0x9fc   :  { %v783_v17 = vrot.slane %v781_v16, 4 }
 0x9fe   :  { %v784_v19 = vadd.f32 %v783_v17, %v781_v16 }
 0xa00   :  { %v785_v20 = vrot.slane %v784_v19, 2 }
 0xa02   :  { %v786_v22 = vadd.f32 %v785_v20, %v784_v19 }
 0xa04   :  { %v787_v23 = vrot.slane %v786_v22, 1 }
 0xa06   :  { %v788_v25 = vadd.f32 %v787_v23, %v786_v22 }
 0xa08   :  { %v789_v26 = vadd.f32 %v788_v25, %v522_v24 }
 0xa0a   :  { %1038 = vst [vmem:[#allocation7] sm:$0x1] %v789_v26 }
 0xa40   :  { %v880_v28 = vpop.f32.mrb[12].mxu1 }
 0xa41   :  { %v881_v29 = vadd.f32 %v1166_v27, %v880_v28  ;;  %v1393_v30 = vpop.f32.mrb[13].mxu1 }
 0xa42   :  { %v883_v31 = vpop.f32.mrb[14].mxu1 }
 0xa43   :  { %v886_v32 = vmax.f32 %v881_v29, 0.0  ;;  %v1394_v33 = vpop.f32.mrb[15].mxu1 }
 0xa45   :  { %v887_v35 = vpack.c.bf16 %v886_v32, %v886_v32 }
 0xa47   :  { %1400 = vmatmul.mubr.msk.bf16.vlgmr.msra.gmra.mrb[16].mxu0 %vm156_vm4, %v887_v35 }
 0xa48   :  { %1404 = vmatpush3.bf16.msra.mxu0 %v1494_v34  ;;  %1407 = vmatprep.mubr.msk.bf16.mxu0 %vm1592_vm2, %v1590_v1 }
 0xa49   :  { %1405 = vmatprep.subr.bf16.mxu0 %v1590_v1  ;;  %v1176_v1 = vld [vmem:[%s2114_s15] ss:$0 sm:$0xff]  ;;  %s1496_s15 = scalar_lea.vmem %s1059_s14, 16 }
 0xa4a   :  { %p1497_p0 = scmp.ne.s32.totalorder %s1059_s14, %s1496_s15  ;;  %p1502_p2 = scmp.lt.s32.totalorder %s1500_s2, %s1496_s15 }
 0xa4c   :  { %1406 = vmatpush3.bf16.msra.mxu0 %v1495_v37  ;;  %p1503_p3 = por %p1502_p2, %p1501_p1 }
 0xa4e   :  { %p1504_p4 = pnand %p1503_p3, %p1497_p0 }
 0xb1a   :  { %v948_v40 = vpop.f32.mrb[16].mxu0 }
 0xb1b   :  { %v949_v5 = vadd.f32 %v1172_v39, %v948_v40  ;;  %v1401_v41 = vpop.f32.mrb[17].mxu0 }
 0xb1c   :  { %v951_v42 = vpop.f32.mrb[18].mxu0 }
 0xb1d   :  { %v954_v43 = vmax.f32 %v949_v5, 0.0  ;;  %v1402_v44 = vpop.f32.mrb[19].mxu0 }
 0xb1f   :  { %v955_v45 = vpack.c.bf16 %v954_v43, %v954_v43 }
 0xb21   :  { %1408 = vmatmul.mubr.msk.bf16.vlgmr.msra.gmra.mrb[20].mxu0 %vm156_vm4, %v955_v45 }
 0xbf4   :  { %v1016_v47 = vpop.f32.mrb[20].mxu0 }
 0xbf5   :  { %v1017_v48 = vadd.f32 %v1176_v1, %v1016_v47  ;;  %v1409_v49 = vpop.f32.mrb[21].mxu0 }
 0xbf6   :  { %v1019_v50 = vpop.f32.mrb[22].mxu0 }
 0xbf7   :  { %v1023_v51 = vsub.f32 %v1711_v4, %v1017_v48  ;;  %1022 = vst.msk [vmem:[#allocation2] sm:$0xff] %vm80_vm3, %v1017_v48  ;;  %v1410_v52 = vpop.f32.mrb[23].mxu0 }
 0xbf9   :  { %v1024_v53 = vand.u32 2147483647, %v1023_v51 }
 0xbfb   :  { %v1026_v56 = vsel %vm80_vm3, %v1024_v53, 0.0 }
 0xbfc   :  { %1027 = vadd.xlane.f32.xlu0 %v1026_v56 }
 0xbfd   :  { %1507 = shalt.err (!%p1504_p4)
}
 0xbfe   :  { %s1508_s8 = scalar_lea.hbm %s2117_s18, 16 }
 0xbff   :  { %p1509_p5 = scmp.ne.s32.totalorder %s2117_s18, %s1508_s8  ;;  %p1512_p6 = scmp.lt.u32.totalorder %s1508_s8, %s2117_s18 }
 0xc01   :  { %p1514_p7 = pnand %p1512_p6, %p1509_p5 }
 0xc03   :  { %1517 = shalt.err (!%p1514_p7)
}
 0xc04   :  { %1061 = dma.vmem_to_hbm [thread:$0]  %s1059_s14, 16, %s2117_s18, [#allocation5]  }
 0xc05   :  { %s1518_s10 = scalar_lea.vmem %s1047_s24, 128  ;;  %p1523_p9 = scmp.lt.s32.totalorder %s1047_s24, %s1047_s24 }
 0xc06   :  { %p1519_p8 = scmp.ne.s32.totalorder %s1047_s24, %s1518_s10  ;;  %p1524_p10 = scmp.lt.s32.totalorder %s1518_s10, %s1518_s10 }
 0xc08   :  { %p1525_p11 = por %p1524_p10, %p1523_p9 }
 0xc0a   :  { %p1526_p12 = pnand %p1525_p11, %p1519_p8 }
 0xc0c   :  { %1529 = shalt.err (!%p1526_p12)
}
 0xc0d   :  { %s1530_s4 = scalar_lea.hbm %s2115_s16, 128 }
 0xc0e   :  { %p1531_p13 = scmp.ne.s32.totalorder %s2115_s16, %s1530_s4  ;;  %p1534_p0 = scmp.lt.u32.totalorder %s1530_s4, %s2115_s16 }
 0xc10   :  { %p1536_p1 = pnand %p1534_p0, %p1531_p13 }
 0xc12   :  { %1539 = shalt.err (!%p1536_p1)
}
 0xc13   :  { %1049 = dma.vmem_to_hbm [thread:$0]  %s1047_s24, 128, %s2115_s16, [#allocation3]  }
 0xc14   :  { %s1597_s1 = smov [#allocation7]  }
 0xc15   :  { %s1078_s22 = sshll.u32 %s1597_s1, 4  ;;  %s1079_s22 = int_to_ptr.vmem [resolvable:$true] %s1078_s22 }
 0xc16   :  { %s1540_s23 = scalar_lea.vmem %s1079_s22, 16  ;;  %s1544_s13 = scalar_lea.vmem %s1079_s22, 32 }
 0xc17   :  { %p1541_p2 = scmp.ne.s32.totalorder %s1079_s22, %s1540_s23  ;;  %p1545_p3 = scmp.lt.s32.totalorder %s1079_s22, %s1079_s22 }
 0xc18   :  { %p1546_p4 = scmp.lt.s32.totalorder %s1544_s13, %s1540_s23 }
 0xc1a   :  { %p1547_p5 = por %p1546_p4, %p1545_p3 }
 0xc1c   :  { %p1548_p6 = pnand %p1547_p5, %p1541_p2 }
 0xc1e   :  { %1551 = shalt.err (!%p1548_p6)
}
 0xc1f   :  { %s1552_s15 = scalar_lea.hbm %s2119_s20, 16 }
 0xc20   :  { %p1553_p7 = scmp.ne.s32.totalorder %s2119_s20, %s1552_s15  ;;  %p1556_p8 = scmp.lt.u32.totalorder %s1552_s15, %s2119_s20 }
 0xc22   :  { %p1558_p9 = pnand %p1556_p8, %p1553_p7 }
 0xc24   :  { %1561 = shalt.err (!%p1558_p9)
}
 0xc25   :  { %1081 = dma.vmem_to_hbm [thread:$0]  %s1079_s22, 16, %s2119_s20, [#allocation8]  }
 0xc26   :  { %s1598_s5 = smov [#allocation6]  }
 0xc27   :  { %s1068_s9 = sshll.u32 %s1598_s5, 4  ;;  %s1069_s9 = int_to_ptr.vmem [resolvable:$true] %s1068_s9 }
 0xc28   :  { %s1562_s17 = scalar_lea.vmem %s1069_s9, 16  ;;  %s1566_s26 = scalar_lea.vmem %s1069_s9, 32 }
 0xc29   :  { %p1563_p10 = scmp.ne.s32.totalorder %s1069_s9, %s1562_s17  ;;  %p1567_p11 = scmp.lt.s32.totalorder %s1069_s9, %s1069_s9 }
 0xc2a   :  { %p1568_p12 = scmp.lt.s32.totalorder %s1566_s26, %s1562_s17 }
 0xc2c   :  { %p1569_p13 = por %p1568_p12, %p1567_p11 }
 0xc2e   :  { %p1570_p0 = pnand %p1569_p13, %p1563_p10 }
 0xc89   :  { %v1028_v4 = vpop.xlane.xlu0 %1027 }
 0xc8a   :  { %v1029_v57 = vrot.slane %v1028_v4, 4 }
 0xc8c   :  { %v1030_v59 = vadd.f32 %v1029_v57, %v1028_v4 }
 0xc8e   :  { %v1031_v36 = vrot.slane %v1030_v59, 2 }
 0xc90   :  { %v1032_v58 = vadd.f32 %v1031_v36, %v1030_v59 }
 0xc92   :  { %v1033_v60 = vrot.slane %v1032_v58, 1 }
 0xc94   :  { %v1034_v38 = vadd.f32 %v1033_v60, %v1032_v58 }
 0xc96   :  { %1036 = vst [vmem:[#allocation6] sm:$0x1] %v1034_v38 }
 0xc97   :  { %1573 = shalt.err (!%p1570_p0)
}
 0xc98   :  { %s1574_s6 = scalar_lea.hbm %s2118_s19, 16 }
 0xc99   :  { %p1575_p1 = scmp.ne.s32.totalorder %s2118_s19, %s1574_s6  ;;  %p1578_p2 = scmp.lt.u32.totalorder %s1574_s6, %s2118_s19 }
 0xc9b   :  { %p1580_p3 = pnand %p1578_p2, %p1575_p1 }
 0xc9d   :  { %1583 = shalt.err (!%p1580_p3)
}
 0xc9e   :  { %1071 = dma.vmem_to_hbm [thread:$0]  %s1069_s9, 16, %s2118_s19, [#allocation5]  }
 0xc9f   :  { %1584 = dma.done.wait [#allocation3], 128  }
 0xca0   :  { %1585 = vsyncadd [#allocation3], 4294967168 }
 0xca1   :  { %1586 = dma.done.wait [#allocation5], 32  }
 0xca2   :  { %1587 = vsyncadd [#allocation5], 4294967264 }
 0xca3   :  { %1588 = dma.done.wait [#allocation8], 16  }
 0xca4   :  { %1589 = vsyncadd [#allocation8], 4294967280 }
 0xca5   :  { %1096 = vsyncpa [#allocation3], 1 }
 0xca6   :  { %1097 = vsyncpa [#allocation5], 1 }
 0xca7   :  { %1098 = vsyncpa [#allocation8], 1 }

</bundles_post_ra>
